<compile_context>
chip_gen: v5e
topology: v5e:2x2
jax: 0.10.0
libtpu: 0.0.40
codegen_flags: <defaults>
</compile_context>

<pallas_src>
import functools

import jax
import jax.numpy as jnp
from jax.experimental import pallas as pl
from jax.experimental.pallas import tpu as pltpu


def _round_up(n, m):
    return ((n + m - 1) // m) * m


def _fused_mlp_kernel(*refs, n_layers, negative_slope):
    """refs = (x, w0, b0, w1, b1, ..., w_{L-1}, b_{L-1}, out).

    All layers are computed in one body; intermediates live in VMEM/vregs.
    Matmul accumulation is always f32; bias add + LeakyReLU run in f32
    (v5e's VPU/EUP have no bf16, and it's harmless on v6e/v7x).
    """
    x_ref = refs[0]
    out_ref = refs[1 + 2 * n_layers]

    h = x_ref[...]
    for i in range(n_layers):
        w = refs[1 + 2 * i][...]          # (Din_pad_i, Dout_pad_i), f32 or bf16
        b = refs[2 + 2 * i][...]          # (1, Dout_pad_i), f32
        h = jnp.dot(h.astype(w.dtype), w, preferred_element_type=jnp.float32)
        h = h + b.astype(jnp.float32)
        if i + 1 < n_layers:              # activation between layers only
            h = jnp.where(h >= 0, h, jnp.float32(negative_slope) * h)
    out_ref[...] = h.astype(out_ref.dtype)


def mlp_forward(x, params, *, negative_slope=0.2, batch_tile=512,
                weight_dtype=jnp.bfloat16, out_dtype=None):
    """Fused Pallas forward of MLP(dims, activation='leakyrelu', batchnorm=False).

    x:       (B, dims[0]) f32
    params:  list of (W, b) with W stored (in_features, out_features),
             i.e. the kernel computes y = x @ W + b (== PyTorch x @ W_pt.T + b).
    weight_dtype: jnp.bfloat16 (default) -> bf16 MXU inputs (weights AND
             streamed activations); None -> keep everything f32.  Accumulation
             and the bias/LeakyReLU epilogue are f32 in both cases.
    out_dtype: dtype of the stored output (default: x.dtype).
    """
    B, Din = x.shape
    n_layers = len(params)
    dims = [Din] + [w.shape[1] for (w, _) in params]
    # Lane-dense feature dims: pad every width to a multiple of 128.
    pdims = [_round_up(max(d, 1), 128) for d in dims]
    out_dtype = x.dtype if out_dtype is None else out_dtype

    # ---- Batch tiling -------------------------------------------------------
    # Multiple of 8 sublanes, capped at batch_tile.
    tb = min(_round_up(B, 8), _round_up(batch_tile, 8))
    # v7x megacore: if the grid would collapse to a single step but there is
    # enough batch for two >=8-row tiles, split so both TensorCores get work.
    if B >= 16 and _round_up(B, tb) // tb < 2:
        tb = _round_up((B + 1) // 2, 8)
    b_pad = _round_up(B, tb)
    grid = (b_pad // tb,)

    # ---- Pad / cast operands (zero padding is exact; see header note) -------
    x_p = jnp.pad(x, ((0, b_pad - B), (0, pdims[0] - dims[0])))
    if weight_dtype is not None:
        x_p = x_p.astype(weight_dtype)            # bf16 activation streaming
    packed = []
    for i, (w, b) in enumerate(params):
        w_p = jnp.pad(w, ((0, pdims[i] - dims[i]), (0, pdims[i + 1] - dims[i + 1])))
        if weight_dtype is not None:
            w_p = w_p.astype(weight_dtype)
        b_p = jnp.pad(b.reshape(1, -1), ((0, 0), (0, pdims[i + 1] - dims[i + 1])))
        packed += [w_p, b_p]                       # bias stays f32 (epilogue)

    # ---- BlockSpecs ----------------------------------------------------------
    in_specs = [pl.BlockSpec((tb, pdims[0]), lambda i: (i, 0))]
    for li in range(n_layers):
        # Constant index_map -> weights/biases DMA'd once, VMEM-resident across
        # all batch tiles.  Buffered(1): no point double-buffering a block whose
        # index never changes; halves resident-weight VMEM.
        in_specs.append(pl.BlockSpec((pdims[li], pdims[li + 1]), lambda i: (0, 0),
                                     pipeline_mode=pl.Buffered(1)))
        in_specs.append(pl.BlockSpec((1, pdims[li + 1]), lambda i: (0, 0),
                                     pipeline_mode=pl.Buffered(1)))
    out_specs = pl.BlockSpec((tb, pdims[-1]), lambda i: (i, 0))

    # ---- VMEM budget ---------------------------------------------------------
    w_item = jnp.dtype(weight_dtype if weight_dtype is not None else jnp.float32).itemsize
    x_item = x_p.dtype.itemsize
    o_item = jnp.dtype(out_dtype).itemsize
    resident = (
        sum(pdims[i] * pdims[i + 1] * w_item for i in range(n_layers))   # weights x1
        + sum(8 * pdims[i + 1] * 4 for i in range(n_layers))             # biases x1 (8-sublane pad)
        + 2 * tb * pdims[0] * x_item                                     # x tile, double-buffered
        + 2 * tb * pdims[-1] * o_item                                    # out tile, double-buffered
        + 2 * tb * max(pdims) * 4                                        # f32 intermediate h slack
    )
    vmem_limit = int(min(max(resident * 1.25, 32 * 1024 * 1024), 64 * 1024 * 1024))

    # ---- Cost estimate from REAL dims (not padded) ---------------------------
    flops = sum(2 * B * dims[i] * dims[i + 1] for i in range(n_layers))
    bytes_accessed = (
        B * dims[0] * x_item
        + sum(dims[i] * dims[i + 1] * w_item + dims[i + 1] * 4 for i in range(n_layers))
        + B * dims[-1] * o_item)

    kernel = functools.partial(
        _fused_mlp_kernel, n_layers=n_layers, negative_slope=negative_slope)

    out_p = pl.pallas_call(
        kernel,
        out_shape=jax.ShapeDtypeStruct((b_pad, pdims[-1]), out_dtype),
        grid=grid,
        in_specs=in_specs,
        out_specs=out_specs,
        compiler_params=pltpu.CompilerParams(
            dimension_semantics=("parallel",),
            vmem_limit_bytes=vmem_limit),
        cost_estimate=pl.CostEstimate(
            flops=flops, transcendentals=0, bytes_accessed=bytes_accessed),
    )(x_p, *packed)

    # Strip padding (padded batch rows contain bias/LeakyReLU garbage and
    # padded feature lanes are zero) — cheap XLA slice outside the kernel.
    return out_p[:B, :dims[-1]]


def init_mlp_params(key, dims):
    """Deterministic init matching nn.Linear's default (uniform +/- 1/sqrt(fan_in))."""
    params = []
    for i in range(len(dims) - 1):
        fan_in, fan_out = dims[i], dims[i + 1]
        key, kw, kb = jax.random.split(key, 3)
        bound = 1.0 / jnp.sqrt(fan_in)
        # stored as (in, out) so kernel computes x @ W
        w = jax.random.uniform(kw, (fan_in, fan_out), jnp.float32, -bound, bound)
        b = jax.random.uniform(kb, (fan_out,), jnp.float32, -bound, bound)
        params.append((w, b))
    return params


def mlp_reference(x, params, *, negative_slope=0.2):
    """Plain-JAX reference for correctness checking."""
    n_layers = len(params)
    for i, (w, b) in enumerate(params):
        x = x @ w + b
        if (i + 1) < n_layers:
            x = jnp.where(x >= 0, x, negative_slope * x)
    return x


if __name__ == "__main__":
    key = jax.random.PRNGKey(0)
    dims = [32, 64, 48, 16]   # MLP(dims=[32, 64, 48, 16])
    batch = 8

    kx, kp = jax.random.split(key)
    x = jax.random.normal(kx, (batch, dims[0]), jnp.float32)
    params = init_mlp_params(kp, dims)
    ref = mlp_reference(x, params)

    fwd = jax.jit(mlp_forward,
                  static_argnames=("negative_slope", "batch_tile",
                                   "weight_dtype", "out_dtype"))

    # 1) Default path: bf16 weights + bf16 activation streaming, f32 epilogue.
    out1 = jax.block_until_ready(fwd(x, params))
    assert out1.shape == (batch, dims[-1])
    assert out1.dtype == x.dtype
    assert jnp.allclose(out1, ref, atol=5e-2, rtol=5e-2), "mismatch vs reference (bf16 default)"

    # 2) Pure f32 path — strict tolerance.
    out2 = jax.block_until_ready(fwd(x, params, weight_dtype=None))
    assert jnp.allclose(out2, ref, atol=1e-5, rtol=1e-5), "mismatch vs reference (f32)"

    # 3) Batch that is neither a multiple of the tile nor of 8 — exercises
    #    batch padding and a multi-step "parallel" grid (f32, strict).
    kx2, _ = jax.random.split(kx)
    x3 = jax.random.normal(kx2, (70, dims[0]), jnp.float32)
    out3 = jax.block_until_ready(fwd(x3, params, batch_tile=32, weight_dtype=None))
    ref3 = mlp_reference(x3, params)
    assert out3.shape == (70, dims[-1])
    assert jnp.allclose(out3, ref3, atol=1e-5, rtol=1e-5), "mismatch vs reference (tiled f32)"

    # 4) B large enough to trigger the >=2-grid-step split (tb -> 24, grid=2)
    #    under the default 512 tile — megacore path, bf16 default.
    x4 = jax.random.normal(kx2, (48, dims[0]), jnp.float32)
    out4 = jax.block_until_ready(fwd(x4, params))
    ref4 = mlp_reference(x4, params)
    assert out4.shape == (48, dims[-1])
    assert jnp.allclose(out4, ref4, atol=5e-2, rtol=5e-2), "mismatch vs reference (split grid)"

    print("KERNEL_OK")
</pallas_src>

<mosaic_0001>
module attributes {stable_mosaic.version = 11 : i64} {
  func.func @_fused_mlp_kernel(%arg0: i32, %arg1: memref<8x128xbf16, #tpu.memory_space<vmem>>, %arg2: memref<128x128xbf16, #tpu.memory_space<vmem>>, %arg3: memref<1x128xf32, #tpu.memory_space<vmem>>, %arg4: memref<128x128xbf16, #tpu.memory_space<vmem>>, %arg5: memref<1x128xf32, #tpu.memory_space<vmem>>, %arg6: memref<128x128xbf16, #tpu.memory_space<vmem>>, %arg7: memref<1x128xf32, #tpu.memory_space<vmem>>, %arg8: memref<8x128xf32, #tpu.memory_space<vmem>>) attributes {dimension_semantics = [#tpu.dimension_semantics<parallel>], iteration_bounds = array<i64: 1>, scalar_prefetch = 0 : i64, scratch_operands = 0 : i64, tpu.core_type = #tpu.core_type<tc>, window_params = [{transform_indices = @transform_0, window_bounds = array<i64: 8, 128>}, {pipeline_mode = #tpu.pipeline_mode<synchronous>, transform_indices = @transform_1, window_bounds = array<i64: 128, 128>}, {pipeline_mode = #tpu.pipeline_mode<synchronous>, transform_indices = @transform_2, window_bounds = array<i64: 1, 128>}, {pipeline_mode = #tpu.pipeline_mode<synchronous>, transform_indices = @transform_3, window_bounds = array<i64: 128, 128>}, {pipeline_mode = #tpu.pipeline_mode<synchronous>, transform_indices = @transform_4, window_bounds = array<i64: 1, 128>}, {pipeline_mode = #tpu.pipeline_mode<synchronous>, transform_indices = @transform_5, window_bounds = array<i64: 128, 128>}, {pipeline_mode = #tpu.pipeline_mode<synchronous>, transform_indices = @transform_6, window_bounds = array<i64: 1, 128>}, {transform_indices = @transform_7, window_bounds = array<i64: 8, 128>}]} {
    %c0 = arith.constant 0 : index
    %c0_0 = arith.constant 0 : index
    %0 = vector.load %arg1[%c0, %c0_0] : memref<8x128xbf16, #tpu.memory_space<vmem>>, vector<8x128xbf16>
    %c0_1 = arith.constant 0 : index
    %c0_2 = arith.constant 0 : index
    %1 = vector.load %arg2[%c0_1, %c0_2] : memref<128x128xbf16, #tpu.memory_space<vmem>>, vector<128x128xbf16>
    %c0_3 = arith.constant 0 : index
    %c0_4 = arith.constant 0 : index
    %2 = vector.load %arg3[%c0_3, %c0_4] : memref<1x128xf32, #tpu.memory_space<vmem>>, vector<1x128xf32>
    %cst = arith.constant dense<0.000000e+00> : vector<8x128xf32>
    %3 = tpu.matmul %0, %1, %cst {dimension_numbers = #tpu.dot_dimension_numbers<[1], [0], [0], [1], [0, 0, 1, 1], [], []>} : vector<8x128xbf16>, vector<128x128xbf16>, vector<8x128xf32> -> vector<8x128xf32>
    %4 = vector.broadcast %2 : vector<1x128xf32> to vector<8x128xf32>
    %5 = arith.addf %3, %4 : vector<8x128xf32>
    %cst_5 = arith.constant 0.000000e+00 : f32
    %6 = vector.broadcast %cst_5 : f32 to vector<8x128xf32>
    %7 = arith.cmpf oge, %5, %6 : vector<8x128xf32>
    %cst_6 = arith.constant 2.000000e-01 : f32
    %8 = vector.broadcast %cst_6 : f32 to vector<8x128xf32>
    %9 = arith.mulf %8, %5 : vector<8x128xf32>
    %10 = arith.select %7, %5, %9 : vector<8x128xi1>, vector<8x128xf32>
    %c0_7 = arith.constant 0 : index
    %c0_8 = arith.constant 0 : index
    %11 = vector.load %arg4[%c0_7, %c0_8] : memref<128x128xbf16, #tpu.memory_space<vmem>>, vector<128x128xbf16>
    %c0_9 = arith.constant 0 : index
    %c0_10 = arith.constant 0 : index
    %12 = vector.load %arg5[%c0_9, %c0_10] : memref<1x128xf32, #tpu.memory_space<vmem>>, vector<1x128xf32>
    %13 = arith.truncf %10 : vector<8x128xf32> to vector<8x128xbf16>
    %cst_11 = arith.constant dense<0.000000e+00> : vector<8x128xf32>
    %14 = tpu.matmul %13, %11, %cst_11 {dimension_numbers = #tpu.dot_dimension_numbers<[1], [0], [0], [1], [0, 0, 1, 1], [], []>} : vector<8x128xbf16>, vector<128x128xbf16>, vector<8x128xf32> -> vector<8x128xf32>
    %15 = vector.broadcast %12 : vector<1x128xf32> to vector<8x128xf32>
    %16 = arith.addf %14, %15 : vector<8x128xf32>
    %cst_12 = arith.constant 0.000000e+00 : f32
    %17 = vector.broadcast %cst_12 : f32 to vector<8x128xf32>
    %18 = arith.cmpf oge, %16, %17 : vector<8x128xf32>
    %cst_13 = arith.constant 2.000000e-01 : f32
    %19 = vector.broadcast %cst_13 : f32 to vector<8x128xf32>
    %20 = arith.mulf %19, %16 : vector<8x128xf32>
    %21 = arith.select %18, %16, %20 : vector<8x128xi1>, vector<8x128xf32>
    %c0_14 = arith.constant 0 : index
    %c0_15 = arith.constant 0 : index
    %22 = vector.load %arg6[%c0_14, %c0_15] : memref<128x128xbf16, #tpu.memory_space<vmem>>, vector<128x128xbf16>
    %c0_16 = arith.constant 0 : index
    %c0_17 = arith.constant 0 : index
    %23 = vector.load %arg7[%c0_16, %c0_17] : memref<1x128xf32, #tpu.memory_space<vmem>>, vector<1x128xf32>
    %24 = arith.truncf %21 : vector<8x128xf32> to vector<8x128xbf16>
    %cst_18 = arith.constant dense<0.000000e+00> : vector<8x128xf32>
    %25 = tpu.matmul %24, %22, %cst_18 {dimension_numbers = #tpu.dot_dimension_numbers<[1], [0], [0], [1], [0, 0, 1, 1], [], []>} : vector<8x128xbf16>, vector<128x128xbf16>, vector<8x128xf32> -> vector<8x128xf32>
    %26 = vector.broadcast %23 : vector<1x128xf32> to vector<8x128xf32>
    %27 = arith.addf %25, %26 : vector<8x128xf32>
    %c0_19 = arith.constant 0 : index
    %c0_20 = arith.constant 0 : index
    %28 = vector.load %arg8[%c0_19, %c0_20] : memref<8x128xf32, #tpu.memory_space<vmem>>, vector<8x128xf32>
    tpu.vector_store %arg8[%c0_19, %c0_20], %27 {strides = array<i32>} : memref<8x128xf32, #tpu.memory_space<vmem>>, vector<8x128xf32>,
    return
  }
  func.func @transform_0(%arg0: i32) -> (i32, i32) {
    %c0_i32 = arith.constant 0 : i32
    %c0_i32_0 = arith.constant 0 : i32
    return %arg0, %c0_i32 : i32, i32
  }
  func.func @transform_1(%arg0: i32) -> (i32, i32) {
    %c0_i32 = arith.constant 0 : i32
    %c0_i32_0 = arith.constant 0 : i32
    %c0_i32_1 = arith.constant 0 : i32
    return %c0_i32, %c0_i32_0 : i32, i32
  }
  func.func @transform_2(%arg0: i32) -> (i32, i32) {
    %c0_i32 = arith.constant 0 : i32
    %c0_i32_0 = arith.constant 0 : i32
    %c0_i32_1 = arith.constant 0 : i32
    return %c0_i32, %c0_i32_0 : i32, i32
  }
  func.func @transform_3(%arg0: i32) -> (i32, i32) {
    %c0_i32 = arith.constant 0 : i32
    %c0_i32_0 = arith.constant 0 : i32
    %c0_i32_1 = arith.constant 0 : i32
    return %c0_i32, %c0_i32_0 : i32, i32
  }
  func.func @transform_4(%arg0: i32) -> (i32, i32) {
    %c0_i32 = arith.constant 0 : i32
    %c0_i32_0 = arith.constant 0 : i32
    %c0_i32_1 = arith.constant 0 : i32
    return %c0_i32, %c0_i32_0 : i32, i32
  }
  func.func @transform_5(%arg0: i32) -> (i32, i32) {
    %c0_i32 = arith.constant 0 : i32
    %c0_i32_0 = arith.constant 0 : i32
    %c0_i32_1 = arith.constant 0 : i32
    return %c0_i32, %c0_i32_0 : i32, i32
  }
  func.func @transform_6(%arg0: i32) -> (i32, i32) {
    %c0_i32 = arith.constant 0 : i32
    %c0_i32_0 = arith.constant 0 : i32
    %c0_i32_1 = arith.constant 0 : i32
    return %c0_i32, %c0_i32_0 : i32, i32
  }
  func.func @transform_7(%arg0: i32) -> (i32, i32) {
    %c0_i32 = arith.constant 0 : i32
    %c0_i32_0 = arith.constant 0 : i32
    return %arg0, %c0_i32 : i32, i32
  }
}

</mosaic_0001>

<bundles_post_ra>
// kernel: mlp_forward.1
= control target key start
LH: loop header
LB: loop body
LE: loop exit
PB: predicated region body
PF: predicated region fallthrough
CT: control target
= control target key end

     0   :  { %s574_s0 = inlined_call_operand.vmem [shape: bf16[8,128], index: 0, kind: input, shape index: {}]   ;;  %s575_s1 = inlined_call_operand.vmem [shape: bf16[128,128], index: 1, kind: input, shape index: {}]   ;;  %s576_s2 = inlined_call_operand.vmem [shape: f32[1,128], index: 2, kind: input, shape index: {}]   ;;  %s577_s3 = inlined_call_operand.vmem [shape: bf16[128,128], index: 3, kind: input, shape index: {}]   ;;  %s578_s4 = inlined_call_operand.vmem [shape: f32[1,128], index: 4, kind: input, shape index: {}]   ;;  %s579_s5 = inlined_call_operand.vmem [shape: bf16[128,128], index: 5, kind: input, shape index: {}]   ;;  %s580_s6 = inlined_call_operand.vmem [shape: f32[1,128], index: 6, kind: input, shape index: {}]   ;;  %s581_s7 = inlined_call_operand.hbm [shape: f32[8,128], index: 7, kind: output, shape index: {}]  }
   0x1   :  { %v399_v0 = vld [vmem:[%s575_s1 + $0x38] sm:$0xff]  ;;  %v398_v1 = vld [vmem:[%s575_s1 + $0x30] sm:$0xff]  ;;  %v397_v4 = vld [vmem:[%s575_s1 + $0x28] sm:$0xff] }
   0x2   :  { %96 = vmatpush.bf16.msra.mxu0 %v399_v0  ;;  %v407_v2 = vld [vmem:[%s577_s3 + $0x38] sm:$0xff]  ;;  %v406_v3 = vld [vmem:[%s577_s3 + $0x30] sm:$0xff] }
   0x3   :  { %181 = vmatpush.bf16.msra.mxu1 %v407_v2 }
   0x6   :  { %97 = vmatpush.bf16.msra.mxu0 %v398_v1 }
   0x7   :  { %12 = vsyncpa [#allocation3], 0  ;;  %182 = vmatpush.bf16.msra.mxu1 %v406_v3  ;;  %v405_v5 = vld [vmem:[%s577_s3 + $0x28] sm:$0xff]  ;;  %v396_v6 = vld [vmem:[%s575_s1 + $0x20] sm:$0xff]  ;;  %s446_s30 = smov [#allocation2]   ;;  %s287_s10 = sshll.u32 %s581_s7, 4  ;;  %s288_s10 = int_to_ptr.hbm [resolvable:$true] %s287_s10 }
   0x8   :  { %v404_v7 = vld [vmem:[%s577_s3 + $0x20] sm:$0xff]  ;;  %v395_v8 = vld [vmem:[%s575_s1 + $0x18] sm:$0xff]  ;;  %v394_v10 = vld [vmem:[%s575_s1 + $0x10] sm:$0xff]  ;;  %s285_s8 = sshll.u32 %s446_s30, 4  ;;  %s286_s8 = int_to_ptr.vmem [resolvable:$true] %s285_s8 }
   0x9   :  { %v403_v9 = vld [vmem:[%s577_s3 + $0x18] sm:$0xff]  ;;  %v402_v11 = vld [vmem:[%s577_s3 + $0x10] sm:$0xff]  ;;  %v393_v12 = vld [vmem:[%s575_s1 + $0x8] sm:$0xff] }
   0xa   :  { %98 = vmatpush.bf16.msra.mxu0 %v397_v4  ;;  %v392_v13 = vld [vmem:[%s575_s1] sm:$0xff]  ;;  %v401_v15 = vld [vmem:[%s577_s3 + $0x8] sm:$0xff]  ;;  %v415_v17 = vld [vmem:[%s579_s5 + $0x38] sm:$0xff] }
   0xb   :  { %183 = vmatpush.bf16.msra.mxu1 %v405_v5  ;;  %v27_v14 = vld [vmem:[%s574_s0] sm:$0xf]  ;;  %266 = vmatpush.bf16.msra.mxu2 %v415_v17  ;;  %v414_v18 = vld [vmem:[%s579_s5 + $0x30] sm:$0xff]  ;;  %v413_v19 = vld [vmem:[%s579_s5 + $0x28] sm:$0xff] }
   0xc   :  { %v400_v16 = vld [vmem:[%s577_s3] sm:$0xff]  ;;  %v411_v21 = vld [vmem:[%s579_s5 + $0x18] sm:$0xff]  ;;  %v410_v22 = vld [vmem:[%s579_s5 + $0x10] sm:$0xff] }
   0xd   :  { %v412_v20 = vld [vmem:[%s579_s5 + $0x20] sm:$0xff]  ;;  %v409_v30 = vld [vmem:[%s579_s5 + $0x8] sm:$0xff] }
   0xe   :  { %99 = vmatpush.bf16.msra.mxu0 %v396_v6  ;;  %v417_v23 = vld [vmem:[%s576_s2] ss:$0 sm:$0xff] }
   0xf   :  { %184 = vmatpush.bf16.msra.mxu1 %v404_v7  ;;  %267 = vmatpush.bf16.msra.mxu2 %v414_v18  ;;  %v408_v31 = vld [vmem:[%s579_s5] sm:$0xff] }
  0x10   :  { %v418_v32 = vld [vmem:[%s578_s4] ss:$0 sm:$0xff] }
  0x11   :  { %v419_v39 = vld [vmem:[%s580_s6] ss:$0 sm:$0xff] }
  0x12   :  { %100 = vmatpush.bf16.msra.mxu0 %v395_v8 }
  0x13   :  { %185 = vmatpush.bf16.msra.mxu1 %v403_v9  ;;  %268 = vmatpush.bf16.msra.mxu2 %v413_v19 }
  0x16   :  { %101 = vmatpush.bf16.msra.mxu0 %v394_v10 }
  0x17   :  { %186 = vmatpush.bf16.msra.mxu1 %v402_v11  ;;  %269 = vmatpush.bf16.msra.mxu2 %v412_v20 }
  0x1a   :  { %102 = vmatpush.bf16.msra.mxu0 %v393_v12 }
  0x1b   :  { %187 = vmatpush.bf16.msra.mxu1 %v401_v15  ;;  %270 = vmatpush.bf16.msra.mxu2 %v411_v21 }
  0x1e   :  { %103 = vmatpush.bf16.msra.mxu0 %v392_v13 }
  0x1f   :  { %188 = vmatpush.bf16.msra.mxu1 %v400_v16  ;;  %271 = vmatpush.bf16.msra.mxu2 %v410_v22 }
  0x21   :  { %104 = vmatmul.bf16.vlgmr.msra.gmra.mxu0 %v27_v14 }
  0x23   :  { %272 = vmatpush.bf16.msra.mxu2 %v409_v30 }
  0x27   :  { %273 = vmatpush.bf16.msra.mxu2 %v408_v31 }
  0x9e   :  { %v105_v24 = vpop.f32.mrf.mxu0 }
  0x9f   :  { %v106_v25 = vadd.f32 %v417_v23, %v105_v24 }
  0xa1   :  { %v110_v26 = vmul.f32 0.2, %v106_v25  ;;  %vm109_vm0 = vcmp.ge.f32.partialorder %v106_v25, 0.0 }
  0xa3   :  { %v111_v27 = vsel %vm109_vm0, %v106_v25, %v110_v26 }
  0xa4   :  { %v129_v28 = vpack.c.bf16 %v111_v27, %v111_v27 }
  0xa6   :  { %v107_v29 = vpop.f32.mrf.mxu0  ;;  %189 = vmatmul.bf16.vlgmr.msra.gmra.mxu1 %v129_v28 }
 0x123   :  { %v190_v33 = vpop.f32.mrf.mxu1 }
 0x124   :  { %v191_v34 = vadd.f32 %v418_v32, %v190_v33 }
 0x126   :  { %v195_v35 = vmul.f32 0.2, %v191_v34  ;;  %vm194_vm1 = vcmp.ge.f32.partialorder %v191_v34, 0.0 }
 0x128   :  { %v196_v36 = vsel %vm194_vm1, %v191_v34, %v195_v35 }
 0x129   :  { %v214_v37 = vpack.c.bf16 %v196_v36, %v196_v36 }
 0x12b   :  { %v192_v38 = vpop.f32.mrf.mxu1  ;;  %274 = vmatmul.bf16.vlgmr.msra.gmra.mxu2 %v214_v37 }
 0x1ae   :  { %v275_v40 = vpop.f32.mrf.mxu2 }
 0x1af   :  { %v276_v41 = vadd.f32 %v419_v39, %v275_v40 }
 0x1b1   :  { %279 = vst [vmem:[#allocation2] sm:$0xff] %v276_v41 }
 0x1b2   :  { %290 = dma.vmem_to_hbm [thread:$0]  %s286_s8, 128, %s288_s10, [#allocation3]  }
 0x1b6   :  { %v277_v42 = vpop.f32.mrf.mxu2 }
 0x1b7   :  { %444 = dma.done.wait [#allocation3], 128  }
 0x1b8   :  { %445 = vsyncadd [#allocation3], 4294967168 }
 0x1b9   :  { %295 = vsyncpa [#allocation3], 1 }

</bundles_post_ra>
